<compile_context>
chip_gen: v7x
topology: tpu7x:2x2x1
jax: 0.10.0
libtpu: 0.0.40
codegen_flags: <defaults>
</compile_context>

<pallas_src>
import functools

import numpy as np
import jax
import jax.numpy as jnp
from jax.experimental import pallas as pl
from jax.experimental.pallas import tpu as pltpu

THRESHOLD = 4
SIGMA = 1.0
IGNORE_INDEX = 255

# Scoped-VMEM limit handed to Mosaic: > v5e's 16 MiB default, < v7x's 64 MiB
# physical per-TensorCore VMEM; v6e has plenty of headroom either way.
VMEM_LIMIT_BYTES = 48 * 1024 * 1024


def _round_up(x, m):
    return -(-x // m) * m


def _choose_time_tile(num_classes, feat_dim, seq_len, in_itemsize):
    """Largest lane-dense (multiple of 128) time tile whose pipeline footprint
    (both double-buffered input streams + tile-dependent scratch) fits inside
    the explicit scoped-VMEM limit, capped at 1024 columns."""
    budget = int(VMEM_LIMIT_BYTES * 0.85)        # headroom for compiler scratch
    # Tile-independent scratch, padded to (8, 128) f32 layout tiles.
    fixed = 4 * (4 * _round_up(num_classes, 8) * 128     # max, 2x sum-exp, pred carry
                 + _round_up(feat_dim, 8) * 128          # feat carry column
                 + 8 * _round_up(feat_dim, 128)          # hoisted MXU ones row
                 + 2 * 8 * 128)                          # double-buffered output blk
    # Per-time-column bytes: two double-buffered input tiles + f32 accumulator.
    per_col = (2 * (_round_up(num_classes, 16) + _round_up(feat_dim, 16))
               * in_itemsize + 8 * 4)
    cols = max(budget - fixed, 0) // per_col
    cols = max(128, (cols // 128) * 128)
    cols = min(cols, 1024)
    return int(min(cols, _round_up(seq_len, 128)))


def _gs_tmse_kernel(counts_ref, pred_ref, feat_ref, out_ref,
                    m_ref, s_a_ref, s_b_ref,
                    pred_carry_ref, feat_carry_ref, acc_ref, ones_ref,
                    *, threshold, sigma):
    """Grid = (sample b, pass p, time-tile t).

    pass 0: shared online max + two masked sum-exps for the two time-axis
            log_softmax windows (kept frames 1..n-1 and 0..n-2).
    pass 1: clamped squared log-softmax difference, Gaussian-similarity
            weighting, lane-resident running sum; per-sample mean written on
            the last tile.
    """
    b = pl.program_id(0)
    p = pl.program_id(1)
    t = pl.program_id(2)
    n_tiles = pl.num_programs(2)

    num_classes = pred_ref.shape[1]
    feat_dim = feat_ref.shape[1]
    tile_t = pred_ref.shape[2]
    use_mxu_norm = feat_dim > 128      # MXU reduce only pays off for large D

    n = counts_ref[b]                  # kept (valid) frames of sample b
    lane = jax.lax.broadcasted_iota(jnp.int32, (1, tile_t), 1)
    g = lane + t * tile_t              # global compacted frame index
    neg = jnp.float32(-1e30)           # finite "-inf"; safe because where selects

    @pl.when(jnp.logical_and(p == 0, t == 0))
    def _init():
        m_ref[...] = jnp.full_like(m_ref, neg)
        s_a_ref[...] = jnp.zeros_like(s_a_ref)
        s_b_ref[...] = jnp.zeros_like(s_b_ref)
        pred_carry_ref[...] = jnp.zeros_like(pred_carry_ref)
        feat_carry_ref[...] = jnp.zeros_like(feat_carry_ref)
        acc_ref[...] = jnp.zeros_like(acc_ref)
        if use_mxu_norm:
            ones_ref[...] = jnp.ones_like(ones_ref)

    @pl.when(p == 0)
    def _pass_lse():
        x = pred_ref[0].astype(jnp.float32)                  # (C, tile_t)
        union = g <= n - 1                                   # frames 0..n-1
        m_new = jnp.maximum(
            m_ref[...],
            jnp.max(jnp.where(union, x, neg), axis=1, keepdims=True))
        # One exp for both windows; the shared (>=) max keeps both LSEs exact.
        e = jnp.where(union, jnp.exp(x - m_new), 0.0)
        rescale = jnp.exp(m_ref[...] - m_new)
        s_a_ref[...] = (s_a_ref[...] * rescale
                        + jnp.sum(jnp.where(g >= 1, e, 0.0),
                                  axis=1, keepdims=True))    # frames 1..n-1
        s_b_ref[...] = (s_b_ref[...] * rescale
                        + jnp.sum(jnp.where(g <= n - 2, e, 0.0),
                                  axis=1, keepdims=True))    # frames 0..n-2
        m_ref[...] = m_new

    @pl.when(p == 1)
    def _pass_loss():
        x = pred_ref[0].astype(jnp.float32)                  # (C, tile_t)
        f = feat_ref[0].astype(jnp.float32)                  # (D, tile_t)

        # lse_a - lse_b: the shared running max cancels.
        lse_diff = jnp.log(s_a_ref[...]) - jnp.log(s_b_ref[...])   # (C, 1)

        # Previous compacted frame for every lane: XLU roll inside the tile
        # plus the carried last column of the previous tile (exact at tile
        # boundaries -- no dropped pairs).
        first_lane = lane == 0
        x_prev = jnp.where(first_lane, pred_carry_ref[...], pltpu.roll(x, 1, 1))
        f_prev = jnp.where(first_lane, feat_carry_ref[...], pltpu.roll(f, 1, 1))

        # (log_softmax(pred[:,1:], time) - log_softmax(pred[:,:-1], time))**2,
        # clamped, then reduced over classes (sublane reduce) -> (1, tile_t).
        r = (x - x_prev) - lse_diff
        loss_c = jnp.sum(jnp.clip(r * r, 0.0, float(threshold) ** 2),
                         axis=0, keepdims=True)

        # Gaussian similarity: exp(-||f_t - f_{t-1}||_2 / (2*sigma^2)).
        sq = (f - f_prev) * (f - f_prev)
        if use_mxu_norm:
            # Over-D reduction on the otherwise idle MXU (ones hoisted to VMEM).
            ssum = jnp.dot(ones_ref[...], sq,
                           preferred_element_type=jnp.float32)[0:1, :]
        else:
            ssum = jnp.sum(sq, axis=0, keepdims=True)        # (1, tile_t)
        sim = jnp.exp(jnp.sqrt(ssum) * (-0.5 / (float(sigma) ** 2)))

        valid = jnp.logical_and(g >= 1, g <= n - 1)          # real pairs only
        acc_ref[...] += jnp.where(valid, sim * loss_c, 0.0)  # lane-resident sum

        # Carry this tile's last column into the next time tile.
        pred_carry_ref[...] = x[:, tile_t - 1:tile_t]
        feat_carry_ref[...] = f[:, tile_t - 1:tile_t]

        @pl.when(t == n_tiles - 1)
        def _finalize():
            total = jnp.sum(acc_ref[...])                    # one x-lane reduce
            pairs = jnp.maximum(n - 1, 1).astype(jnp.float32)
            denom = jnp.float32(num_classes) * pairs
            val = jnp.where(n > 1, total / denom, jnp.float32(0.0))
            out_ref[...] = jnp.full(out_ref.shape, val, jnp.float32)


def gaussian_similarity_tmse(preds, gts, feats, *, threshold=THRESHOLD,
                             sigma=SIGMA, ignore_index=IGNORE_INDEX,
                             input_dtype=jnp.bfloat16):
    """preds: (B, C, T), gts: (B, T) int, feats: (B, D, T) -> scalar f32."""
    batch, num_classes, seq_len = preds.shape
    feat_dim = feats.shape[1]

    # HBM-bandwidth-bound kernel: move inputs to bf16 (compute stays f32).
    preds = preds.astype(input_dtype)
    feats = feats.astype(input_dtype)
    in_itemsize = jnp.dtype(input_dtype).itemsize

    # TODO(synk): the data-dependent frame selection (gt != ignore_index) has no
    # clean static-shape Pallas equivalent; the compaction gather stays as XLA
    # ops (if profiling shows it dominating, pass `order` as a second
    # scalar-prefetch arg and gather per tile with manual DMA inside the kernel).
    keep = gts != ignore_index                                     # (B, T)
    counts = jnp.sum(keep, axis=-1).astype(jnp.int32)              # (B,)
    order = jnp.argsort(jnp.logical_not(keep).astype(jnp.int32),
                        axis=-1, stable=True)                      # kept first

    tile_t = _choose_time_tile(num_classes, feat_dim, seq_len, in_itemsize)
    seq_pad = _round_up(seq_len, tile_t)
    if seq_pad != seq_len:
        # Pad only the tiny (B, T) index array; the gather below then emits the
        # already lane-padded layout.  Padded columns are don't-care: the kernel
        # masks every compacted frame index >= counts[b].
        order = jnp.pad(order, ((0, 0), (0, seq_pad - seq_len)))
    n_tiles = seq_pad // tile_t

    preds_c = jnp.take_along_axis(preds, order[:, None, :], axis=2)  # (B,C,Tp)
    feats_c = jnp.take_along_axis(feats, order[:, None, :], axis=2)  # (B,D,Tp)

    kernel = functools.partial(_gs_tmse_kernel, threshold=float(threshold),
                               sigma=float(sigma))

    # TODO(synk): with only the batch axis "parallel", v7x megacore gives no
    # speedup for B == 1 (and is imbalanced for odd B); a per-core time split
    # with partial-LSE merge would fix that but is not implemented here.
    per_sample = pl.pallas_call(
        kernel,
        out_shape=jax.ShapeDtypeStruct((batch, 1, 128), jnp.float32),
        grid_spec=pltpu.PrefetchScalarGridSpec(
            num_scalar_prefetch=1,
            grid=(batch, 2, n_tiles),             # (sample, pass, time-tile)
            in_specs=[
                pl.BlockSpec((1, num_classes, tile_t),
                             lambda b, p, t, cnt: (b, 0, t)),
                # feats are only read in pass 1; pinning the block index to 0
                # during pass 0 avoids re-issuing its DMA per time-tile there.
                pl.BlockSpec((1, feat_dim, tile_t),
                             lambda b, p, t, cnt: (b, 0, t * p)),
            ],
            out_specs=pl.BlockSpec((1, 1, 128),
                                   lambda b, p, t, cnt: (b, 0, 0)),
            scratch_shapes=[
                pltpu.VMEM((num_classes, 1), jnp.float32),  # shared running max
                pltpu.VMEM((num_classes, 1), jnp.float32),  # sum-exp frames 1..n-1
                pltpu.VMEM((num_classes, 1), jnp.float32),  # sum-exp frames 0..n-2
                pltpu.VMEM((num_classes, 1), jnp.float32),  # pred carry column
                pltpu.VMEM((feat_dim, 1), jnp.float32),     # feat carry column
                pltpu.VMEM((1, tile_t), jnp.float32),       # lane-resident accum
                pltpu.VMEM((8, feat_dim), jnp.float32),     # hoisted MXU ones
            ],
        ),
        compiler_params=pltpu.CompilerParams(
            dimension_semantics=("parallel", "arbitrary", "arbitrary"),
            vmem_limit_bytes=VMEM_LIMIT_BYTES,
        ),
    )(counts, preds_c, feats_c)

    return jnp.sum(per_sample[:, 0, 0]) / batch


def _reference(preds, gts, feats, threshold=THRESHOLD, sigma=SIGMA,
               ignore_index=IGNORE_INDEX):
    """Pure NumPy (float64) reference mirroring the PyTorch forward."""
    preds = np.asarray(preds, dtype=np.float64)
    feats = np.asarray(feats, dtype=np.float64)
    gts_np = np.asarray(gts)
    total = 0.0
    for b in range(preds.shape[0]):
        keep = np.where(gts_np[b] != ignore_index)[0]
        pred = preds[b][:, keep]
        feat = feats[b][:, keep]

        diff = feat[:, 1:] - feat[:, :-1]
        similarity = np.exp(-np.linalg.norm(diff, axis=0) / (2 * sigma ** 2))

        def log_softmax_t(x):
            m = x.max(axis=1, keepdims=True)
            z = x - m
            return z - np.log(np.exp(z).sum(axis=1, keepdims=True))

        a = log_softmax_t(pred[:, 1:])
        c = log_softmax_t(pred[:, :-1])
        loss = np.clip((a - c) ** 2, 0.0, threshold ** 2)
        loss = similarity[None, :] * loss
        total += loss.mean()
    return total / preds.shape[0]


if __name__ == "__main__":
    key = jax.random.PRNGKey(0)
    B, C, D, T = 2, 4, 32, 16   # batch, num_classes, feature dim, sequence len

    k1, k2, k3 = jax.random.split(key, 3)
    preds = jax.random.normal(k1, (B, C, T), dtype=jnp.float32)
    feats = jax.random.normal(k2, (B, D, T), dtype=jnp.float32)
    gts = jax.random.randint(k3, (B, T), 0, C, dtype=jnp.int32)
    # Inject a few ignore_index frames to exercise the compaction/mask path.
    gts_np = np.asarray(gts).copy()
    gts_np[0, 3] = IGNORE_INDEX
    gts_np[1, 0] = IGNORE_INDEX
    gts_np[1, 7] = IGNORE_INDEX
    gts = jnp.asarray(gts_np)

    loss_fn = jax.jit(gaussian_similarity_tmse)
    out = jax.block_until_ready(loss_fn(preds, gts, feats))

    # Reference on the same bf16-quantized inputs the kernel consumes (all
    # in-kernel arithmetic is f32, so the comparison isolates kernel math).
    preds_q = np.asarray(preds.astype(jnp.bfloat16).astype(jnp.float32))
    feats_q = np.asarray(feats.astype(jnp.bfloat16).astype(jnp.float32))
    ref = _reference(preds_q, gts, feats_q)
    np.testing.assert_allclose(np.asarray(out), ref, rtol=2e-4, atol=1e-5)

    print("KERNEL_OK")
</pallas_src>

<mosaic_0001>
module attributes {stable_mosaic.version = 11 : i64} {
  func.func @_gs_tmse_kernel(%arg0: i32, %arg1: i32, %arg2: i32, %arg3: memref<2xi32, #tpu.memory_space<smem>>, %arg4: memref<1x4x128xbf16, #tpu.memory_space<vmem>>, %arg5: memref<1x32x128xbf16, #tpu.memory_space<vmem>>, %arg6: memref<1x1x128xf32, #tpu.memory_space<vmem>>, %arg7: memref<4x1xf32, #tpu.memory_space<vmem>>, %arg8: memref<4x1xf32, #tpu.memory_space<vmem>>, %arg9: memref<4x1xf32, #tpu.memory_space<vmem>>, %arg10: memref<4x1xf32, #tpu.memory_space<vmem>>, %arg11: memref<32x1xf32, #tpu.memory_space<vmem>>, %arg12: memref<1x128xf32, #tpu.memory_space<vmem>>, %arg13: memref<8x32xf32, #tpu.memory_space<vmem>>) attributes {dimension_semantics = [#tpu.dimension_semantics<parallel>, #tpu.dimension_semantics<arbitrary>, #tpu.dimension_semantics<arbitrary>], iteration_bounds = array<i64: 2, 2, 1>, scalar_prefetch = 1 : i64, scratch_operands = 7 : i64, tpu.core_type = #tpu.core_type<tc>, window_params = [{transform_indices = @transform_0, window_bounds = array<i64: 1, 4, 128>}, {transform_indices = @transform_1, window_bounds = array<i64: 1, 32, 128>}, {transform_indices = @transform_2, window_bounds = array<i64: 1, 1, 128>}]} {
    %0 = arith.index_cast %arg0 : i32 to index
    %1 = memref.load %arg3[%0] : memref<2xi32, #tpu.memory_space<smem>>
    %2 = tpu.iota {dimensions = array<i32: 1>} : vector<1x128xi32>
    %c128_i32 = arith.constant 128 : i32
    %3 = arith.muli %arg2, %c128_i32 : i32
    %4 = vector.broadcast %3 : i32 to vector<1x128xi32>
    %5 = arith.addi %2, %4 : vector<1x128xi32>
    %c0_i32 = arith.constant 0 : i32
    %6 = arith.cmpi eq, %arg1, %c0_i32 : i32
    %c0_i32_0 = arith.constant 0 : i32
    %7 = arith.cmpi eq, %arg2, %c0_i32_0 : i32
    %8 = arith.andi %6, %7 : i1
    %9 = arith.extui %8 : i1 to i32
    %cst = arith.constant -1.000000e+30 : f32
    %c0_i32_1 = arith.constant 0 : i32
    %10 = arith.cmpi ne, %9, %c0_i32_1 : i32
    scf.if %10 {
      %17 = vector.broadcast %cst : f32 to vector<4x1xf32>
      %c0 = arith.constant 0 : index
      %c0_6 = arith.constant 0 : index
      %18 = vector.load %arg7[%c0, %c0_6] : memref<4x1xf32, #tpu.memory_space<vmem>>, vector<4x1xf32>
      tpu.vector_store %arg7[%c0, %c0_6], %17 {strides = array<i32>} : memref<4x1xf32, #tpu.memory_space<vmem>>, vector<4x1xf32>,
      %cst_7 = arith.constant 0.000000e+00 : f32
      %19 = vector.broadcast %cst_7 : f32 to vector<4x1xf32>
      %c0_8 = arith.constant 0 : index
      %c0_9 = arith.constant 0 : index
      %20 = vector.load %arg8[%c0_8, %c0_9] : memref<4x1xf32, #tpu.memory_space<vmem>>, vector<4x1xf32>
      tpu.vector_store %arg8[%c0_8, %c0_9], %19 {strides = array<i32>} : memref<4x1xf32, #tpu.memory_space<vmem>>, vector<4x1xf32>,
      %cst_10 = arith.constant 0.000000e+00 : f32
      %21 = vector.broadcast %cst_10 : f32 to vector<4x1xf32>
      %c0_11 = arith.constant 0 : index
      %c0_12 = arith.constant 0 : index
      %22 = vector.load %arg9[%c0_11, %c0_12] : memref<4x1xf32, #tpu.memory_space<vmem>>, vector<4x1xf32>
      tpu.vector_store %arg9[%c0_11, %c0_12], %21 {strides = array<i32>} : memref<4x1xf32, #tpu.memory_space<vmem>>, vector<4x1xf32>,
      %cst_13 = arith.constant 0.000000e+00 : f32
      %23 = vector.broadcast %cst_13 : f32 to vector<4x1xf32>
      %c0_14 = arith.constant 0 : index
      %c0_15 = arith.constant 0 : index
      %24 = vector.load %arg10[%c0_14, %c0_15] : memref<4x1xf32, #tpu.memory_space<vmem>>, vector<4x1xf32>
      tpu.vector_store %arg10[%c0_14, %c0_15], %23 {strides = array<i32>} : memref<4x1xf32, #tpu.memory_space<vmem>>, vector<4x1xf32>,
      %cst_16 = arith.constant 0.000000e+00 : f32
      %25 = vector.broadcast %cst_16 : f32 to vector<32x1xf32>
      %c0_17 = arith.constant 0 : index
      %c0_18 = arith.constant 0 : index
      %26 = vector.load %arg11[%c0_17, %c0_18] : memref<32x1xf32, #tpu.memory_space<vmem>>, vector<32x1xf32>
      tpu.vector_store %arg11[%c0_17, %c0_18], %25 {strides = array<i32>} : memref<32x1xf32, #tpu.memory_space<vmem>>, vector<32x1xf32>,
      %cst_19 = arith.constant 0.000000e+00 : f32
      %27 = vector.broadcast %cst_19 : f32 to vector<1x128xf32>
      %c0_20 = arith.constant 0 : index
      %c0_21 = arith.constant 0 : index
      %28 = vector.load %arg12[%c0_20, %c0_21] : memref<1x128xf32, #tpu.memory_space<vmem>>, vector<1x128xf32>
      tpu.vector_store %arg12[%c0_20, %c0_21], %27 {strides = array<i32>} : memref<1x128xf32, #tpu.memory_space<vmem>>, vector<1x128xf32>,
    } else {
    }
    %c0_i32_2 = arith.constant 0 : i32
    %11 = arith.cmpi eq, %arg1, %c0_i32_2 : i32
    %12 = arith.extui %11 : i1 to i32
    %cst_3 = arith.constant -1.000000e+30 : f32
    %c0_i32_4 = arith.constant 0 : i32
    %13 = arith.cmpi ne, %12, %c0_i32_4 : i32
    scf.if %13 {
      %c0 = arith.constant 0 : index
      %c0_6 = arith.constant 0 : index
      %c0_7 = arith.constant 0 : index
      %17 = vector.load %arg4[%c0, %c0_6, %c0_7] : memref<1x4x128xbf16, #tpu.memory_space<vmem>>, vector<1x4x128xbf16>
      %18 = vector.shape_cast %17 : vector<1x4x128xbf16> to vector<4x128xbf16>
      %19 = arith.extf %18 : vector<4x128xbf16> to vector<4x128xf32>
      %c1_i32_8 = arith.constant 1 : i32
      %20 = arith.subi %1, %c1_i32_8 : i32
      %21 = vector.broadcast %20 : i32 to vector<1x128xi32>
      %22 = arith.cmpi sle, %5, %21 : vector<1x128xi32>
      %c0_9 = arith.constant 0 : index
      %c0_10 = arith.constant 0 : index
      %23 = vector.load %arg7[%c0_9, %c0_10] : memref<4x1xf32, #tpu.memory_space<vmem>>, vector<4x1xf32>
      %24 = vector.shape_cast %22 : vector<1x128xi1> to vector<1x128xi1>
      %25 = vector.broadcast %24 : vector<1x128xi1> to vector<4x128xi1>
      %26 = vector.broadcast %cst_3 : f32 to vector<4x128xf32>
      %27 = arith.select %25, %19, %26 : vector<4x128xi1>, vector<4x128xf32>
      %cst_11 = arith.constant dense<0xFF800000> : vector<4xf32>
      %28 = vector.multi_reduction <maximumf>, %27, %cst_11 [1] : vector<4x128xf32> to vector<4xf32>
      %29 = vector.shape_cast %28 : vector<4xf32> to vector<4x1xf32>
      %30 = arith.maximumf %23, %29 : vector<4x1xf32>
      %31 = vector.broadcast %30 : vector<4x1xf32> to vector<4x128xf32>
      %32 = arith.subf %19, %31 : vector<4x128xf32>
      %33 = math.exp %32 : vector<4x128xf32>
      %cst_12 = arith.constant 0.000000e+00 : f32
      %34 = vector.shape_cast %22 : vector<1x128xi1> to vector<1x128xi1>
      %35 = vector.broadcast %34 : vector<1x128xi1> to vector<4x128xi1>
      %36 = vector.broadcast %cst_12 : f32 to vector<4x128xf32>
      %37 = arith.select %35, %33, %36 : vector<4x128xi1>, vector<4x128xf32>
      %c0_13 = arith.constant 0 : index
      %c0_14 = arith.constant 0 : index
      %38 = vector.load %arg7[%c0_13, %c0_14] : memref<4x1xf32, #tpu.memory_space<vmem>>, vector<4x1xf32>
      %39 = arith.subf %38, %30 : vector<4x1xf32>
      %40 = math.exp %39 : vector<4x1xf32>
      %c0_15 = arith.constant 0 : index
      %c0_16 = arith.constant 0 : index
      %41 = vector.load %arg8[%c0_15, %c0_16] : memref<4x1xf32, #tpu.memory_space<vmem>>, vector<4x1xf32>
      %42 = arith.mulf %41, %40 : vector<4x1xf32>
      %c1_i32_17 = arith.constant 1 : i32
      %43 = vector.broadcast %c1_i32_17 : i32 to vector<1x128xi32>
      %44 = arith.cmpi sge, %5, %43 : vector<1x128xi32>
      %cst_18 = arith.constant 0.000000e+00 : f32
      %45 = vector.shape_cast %44 : vector<1x128xi1> to vector<1x128xi1>
      %46 = vector.broadcast %45 : vector<1x128xi1> to vector<4x128xi1>
      %47 = vector.broadcast %cst_18 : f32 to vector<4x128xf32>
      %48 = arith.select %46, %37, %47 : vector<4x128xi1>, vector<4x128xf32>
      %cst_19 = arith.constant dense<0.000000e+00> : vector<4xf32>
      %49 = vector.multi_reduction <add>, %48, %cst_19 [1] : vector<4x128xf32> to vector<4xf32>
      %50 = vector.shape_cast %49 : vector<4xf32> to vector<4x1xf32>
      %51 = arith.addf %42, %50 : vector<4x1xf32>
      %c0_20 = arith.constant 0 : index
      %c0_21 = arith.constant 0 : index
      %52 = vector.load %arg8[%c0_20, %c0_21] : memref<4x1xf32, #tpu.memory_space<vmem>>, vector<4x1xf32>
      tpu.vector_store %arg8[%c0_20, %c0_21], %51 {strides = array<i32>} : memref<4x1xf32, #tpu.memory_space<vmem>>, vector<4x1xf32>,
      %c0_22 = arith.constant 0 : index
      %c0_23 = arith.constant 0 : index
      %53 = vector.load %arg9[%c0_22, %c0_23] : memref<4x1xf32, #tpu.memory_space<vmem>>, vector<4x1xf32>
      %54 = arith.mulf %53, %40 : vector<4x1xf32>
      %c2_i32 = arith.constant 2 : i32
      %55 = arith.subi %1, %c2_i32 : i32
      %56 = vector.broadcast %55 : i32 to vector<1x128xi32>
      %57 = arith.cmpi sle, %5, %56 : vector<1x128xi32>
      %cst_24 = arith.constant 0.000000e+00 : f32
      %58 = vector.shape_cast %57 : vector<1x128xi1> to vector<1x128xi1>
      %59 = vector.broadcast %58 : vector<1x128xi1> to vector<4x128xi1>
      %60 = vector.broadcast %cst_24 : f32 to vector<4x128xf32>
      %61 = arith.select %59, %37, %60 : vector<4x128xi1>, vector<4x128xf32>
      %cst_25 = arith.constant dense<0.000000e+00> : vector<4xf32>
      %62 = vector.multi_reduction <add>, %61, %cst_25 [1] : vector<4x128xf32> to vector<4xf32>
      %63 = vector.shape_cast %62 : vector<4xf32> to vector<4x1xf32>
      %64 = arith.addf %54, %63 : vector<4x1xf32>
      %c0_26 = arith.constant 0 : index
      %c0_27 = arith.constant 0 : index
      %65 = vector.load %arg9[%c0_26, %c0_27] : memref<4x1xf32, #tpu.memory_space<vmem>>, vector<4x1xf32>
      tpu.vector_store %arg9[%c0_26, %c0_27], %64 {strides = array<i32>} : memref<4x1xf32, #tpu.memory_space<vmem>>, vector<4x1xf32>,
      %c0_28 = arith.constant 0 : index
      %c0_29 = arith.constant 0 : index
      %66 = vector.load %arg7[%c0_28, %c0_29] : memref<4x1xf32, #tpu.memory_space<vmem>>, vector<4x1xf32>
      tpu.vector_store %arg7[%c0_28, %c0_29], %30 {strides = array<i32>} : memref<4x1xf32, #tpu.memory_space<vmem>>, vector<4x1xf32>,
    } else {
    }
    %c1_i32 = arith.constant 1 : i32
    %14 = arith.cmpi eq, %arg1, %c1_i32 : i32
    %15 = arith.extui %14 : i1 to i32
    %c0_i32_5 = arith.constant 0 : i32
    %16 = arith.cmpi ne, %15, %c0_i32_5 : i32
    scf.if %16 {
      %c0 = arith.constant 0 : index
      %c0_6 = arith.constant 0 : index
      %c0_7 = arith.constant 0 : index
      %17 = vector.load %arg4[%c0, %c0_6, %c0_7] : memref<1x4x128xbf16, #tpu.memory_space<vmem>>, vector<1x4x128xbf16>
      %18 = vector.shape_cast %17 : vector<1x4x128xbf16> to vector<4x128xbf16>
      %19 = arith.extf %18 : vector<4x128xbf16> to vector<4x128xf32>
      %c0_8 = arith.constant 0 : index
      %c0_9 = arith.constant 0 : index
      %c0_10 = arith.constant 0 : index
      %20 = vector.load %arg5[%c0_8, %c0_9, %c0_10] : memref<1x32x128xbf16, #tpu.memory_space<vmem>>, vector<1x32x128xbf16>
      %21 = vector.shape_cast %20 : vector<1x32x128xbf16> to vector<32x128xbf16>
      %22 = arith.extf %21 : vector<32x128xbf16> to vector<32x128xf32>
      %c0_11 = arith.constant 0 : index
      %c0_12 = arith.constant 0 : index
      %23 = vector.load %arg8[%c0_11, %c0_12] : memref<4x1xf32, #tpu.memory_space<vmem>>, vector<4x1xf32>
      %24 = math.log %23 : vector<4x1xf32>
      %c0_13 = arith.constant 0 : index
      %c0_14 = arith.constant 0 : index
      %25 = vector.load %arg9[%c0_13, %c0_14] : memref<4x1xf32, #tpu.memory_space<vmem>>, vector<4x1xf32>
      %26 = math.log %25 : vector<4x1xf32>
      %27 = arith.subf %24, %26 : vector<4x1xf32>
      %c0_i32_15 = arith.constant 0 : i32
      %28 = vector.broadcast %c0_i32_15 : i32 to vector<1x128xi32>
      %29 = arith.cmpi eq, %2, %28 : vector<1x128xi32>
      %c0_16 = arith.constant 0 : index
      %c0_17 = arith.constant 0 : index
      %30 = vector.load %arg10[%c0_16, %c0_17] : memref<4x1xf32, #tpu.memory_space<vmem>>, vector<4x1xf32>
      %c1_i32_18 = arith.constant 1 : i32
      %31 = tpu.dynamic_rotate %19 by %c1_i32_18 dim 1 : vector<4x128xf32>, i32 -> vector<4x128xf32>
      %32 = vector.shape_cast %29 : vector<1x128xi1> to vector<1x128xi1>
      %33 = vector.broadcast %32 : vector<1x128xi1> to vector<4x128xi1>
      %34 = vector.shape_cast %30 : vector<4x1xf32> to vector<4x1xf32>
      %35 = vector.broadcast %34 : vector<4x1xf32> to vector<4x128xf32>
      %36 = arith.select %33, %35, %31 : vector<4x128xi1>, vector<4x128xf32>
      %c0_19 = arith.constant 0 : index
      %c0_20 = arith.constant 0 : index
      %37 = vector.load %arg11[%c0_19, %c0_20] : memref<32x1xf32, #tpu.memory_space<vmem>>, vector<32x1xf32>
      %c1_i32_21 = arith.constant 1 : i32
      %38 = tpu.dynamic_rotate %22 by %c1_i32_21 dim 1 : vector<32x128xf32>, i32 -> vector<32x128xf32>
      %39 = vector.shape_cast %29 : vector<1x128xi1> to vector<1x128xi1>
      %40 = vector.broadcast %39 : vector<1x128xi1> to vector<32x128xi1>
      %41 = vector.shape_cast %37 : vector<32x1xf32> to vector<32x1xf32>
      %42 = vector.broadcast %41 : vector<32x1xf32> to vector<32x128xf32>
      %43 = arith.select %40, %42, %38 : vector<32x128xi1>, vector<32x128xf32>
      %44 = arith.subf %19, %36 : vector<4x128xf32>
      %45 = vector.broadcast %27 : vector<4x1xf32> to vector<4x128xf32>
      %46 = arith.subf %44, %45 : vector<4x128xf32>
      %47 = arith.mulf %46, %46 : vector<4x128xf32>
      %cst_22 = arith.constant 0.000000e+00 : f32
      %cst_23 = arith.constant 1.600000e+01 : f32
      %48 = vector.broadcast %cst_22 : f32 to vector<4x128xf32>
      %49 = arith.maximumf %48, %47 : vector<4x128xf32>
      %50 = vector.broadcast %cst_23 : f32 to vector<4x128xf32>
      %51 = arith.minimumf %50, %49 : vector<4x128xf32>
      %cst_24 = arith.constant dense<0.000000e+00> : vector<128xf32>
      %52 = vector.multi_reduction <add>, %51, %cst_24 [0] : vector<4x128xf32> to vector<128xf32>
      %53 = vector.shape_cast %52 : vector<128xf32> to vector<1x128xf32>
      %54 = arith.subf %22, %43 : vector<32x128xf32>
      %55 = arith.subf %22, %43 : vector<32x128xf32>
      %56 = arith.mulf %54, %55 : vector<32x128xf32>
      %cst_25 = arith.constant dense<0.000000e+00> : vector<128xf32>
      %57 = vector.multi_reduction <add>, %56, %cst_25 [0] : vector<32x128xf32> to vector<128xf32>
      %58 = vector.shape_cast %57 : vector<128xf32> to vector<1x128xf32>
      %59 = math.sqrt %58 : vector<1x128xf32>
      %cst_26 = arith.constant -5.000000e-01 : f32
      %60 = vector.broadcast %cst_26 : f32 to vector<1x128xf32>
      %61 = arith.mulf %59, %60 : vector<1x128xf32>
      %62 = math.exp %61 : vector<1x128xf32>
      %c1_i32_27 = arith.constant 1 : i32
      %63 = vector.broadcast %c1_i32_27 : i32 to vector<1x128xi32>
      %64 = arith.cmpi sge, %5, %63 : vector<1x128xi32>
      %c1_i32_28 = arith.constant 1 : i32
      %65 = arith.subi %1, %c1_i32_28 : i32
      %66 = vector.broadcast %65 : i32 to vector<1x128xi32>
      %67 = arith.cmpi sle, %5, %66 : vector<1x128xi32>
      %68 = arith.andi %64, %67 : vector<1x128xi1>
      %c0_29 = arith.constant 0 : index
      %c0_30 = arith.constant 0 : index
      %69 = vector.load %arg12[%c0_29, %c0_30] : memref<1x128xf32, #tpu.memory_space<vmem>>, vector<1x128xf32>
      %70 = arith.mulf %62, %53 : vector<1x128xf32>
      %cst_31 = arith.constant 0.000000e+00 : f32
      %71 = vector.broadcast %cst_31 : f32 to vector<1x128xf32>
      %72 = arith.select %68, %70, %71 : vector<1x128xi1>, vector<1x128xf32>
      %73 = arith.addf %69, %72 : vector<1x128xf32>
      %c0_32 = arith.constant 0 : index
      %c0_33 = arith.constant 0 : index
      %74 = vector.load %arg12[%c0_32, %c0_33] : memref<1x128xf32, #tpu.memory_space<vmem>>, vector<1x128xf32>
      tpu.vector_store %arg12[%c0_32, %c0_33], %73 {strides = array<i32>} : memref<1x128xf32, #tpu.memory_space<vmem>>, vector<1x128xf32>,
      %75 = vector.extract_strided_slice %19 {offsets = [0, 127], sizes = [4, 1], strides = [1, 1]} : vector<4x128xf32> to vector<4x1xf32>
      %c0_34 = arith.constant 0 : index
      %c0_35 = arith.constant 0 : index
      %76 = vector.load %arg10[%c0_34, %c0_35] : memref<4x1xf32, #tpu.memory_space<vmem>>, vector<4x1xf32>
      tpu.vector_store %arg10[%c0_34, %c0_35], %75 {strides = array<i32>} : memref<4x1xf32, #tpu.memory_space<vmem>>, vector<4x1xf32>,
      %77 = vector.extract_strided_slice %22 {offsets = [0, 127], sizes = [32, 1], strides = [1, 1]} : vector<32x128xf32> to vector<32x1xf32>
      %c0_36 = arith.constant 0 : index
      %c0_37 = arith.constant 0 : index
      %78 = vector.load %arg11[%c0_36, %c0_37] : memref<32x1xf32, #tpu.memory_space<vmem>>, vector<32x1xf32>
      tpu.vector_store %arg11[%c0_36, %c0_37], %77 {strides = array<i32>} : memref<32x1xf32, #tpu.memory_space<vmem>>, vector<32x1xf32>,
      %c0_i32_38 = arith.constant 0 : i32
      %79 = arith.cmpi eq, %arg2, %c0_i32_38 : i32
      %80 = arith.extui %79 : i1 to i32
      %c0_i32_39 = arith.constant 0 : i32
      %81 = arith.cmpi ne, %80, %c0_i32_39 : i32
      scf.if %81 {
        %c0_40 = arith.constant 0 : index
        %c0_41 = arith.constant 0 : index
        %82 = vector.load %arg12[%c0_40, %c0_41] : memref<1x128xf32, #tpu.memory_space<vmem>>, vector<1x128xf32>
        %83 = vector.shape_cast %82 : vector<1x128xf32> to vector<1x1x128xf32>
        %cst_42 = arith.constant dense<0.000000e+00> : vector<1xf32>
        %84 = vector.multi_reduction <add>, %83, %cst_42 [1, 2] : vector<1x1x128xf32> to vector<1xf32>
        %85 = vector.shape_cast %84 : vector<1xf32> to vector<1x1x1xf32>
        %86 = vector.extract %85[0, 0, 0] : f32 from vector<1x1x1xf32>
        %c1_i32_43 = arith.constant 1 : i32
        %87 = arith.subi %1, %c1_i32_43 : i32
        %c1_i32_44 = arith.constant 1 : i32
        %88 = arith.maxsi %87, %c1_i32_44 : i32
        %89 = arith.sitofp %88 : i32 to f32
        %cst_45 = arith.constant 4.000000e+00 : f32
        %90 = arith.mulf %cst_45, %89 : f32
        %c1_i32_46 = arith.constant 1 : i32
        %91 = arith.cmpi sgt, %1, %c1_i32_46 : i32
        %92 = arith.divf %86, %90 : f32
        %cst_47 = arith.constant 0.000000e+00 : f32
        %93 = arith.select %91, %92, %cst_47 : f32
        %94 = vector.broadcast %93 : f32 to vector<1x1x128xf32>
        %c0_48 = arith.constant 0 : index
        %c0_49 = arith.constant 0 : index
        %c0_50 = arith.constant 0 : index
        %95 = vector.load %arg6[%c0_48, %c0_49, %c0_50] : memref<1x1x128xf32, #tpu.memory_space<vmem>>, vector<1x1x128xf32>
        tpu.vector_store %arg6[%c0_48, %c0_49, %c0_50], %94 {strides = array<i32>} : memref<1x1x128xf32, #tpu.memory_space<vmem>>, vector<1x1x128xf32>,
      } else {
      }
    } else {
    }
    return
  }
  func.func @transform_0(%arg0: i32, %arg1: i32, %arg2: i32, %arg3: memref<2xi32, #tpu.memory_space<smem>>) -> (i32, i32, i32) {
    %c0_i32 = arith.constant 0 : i32
    %c0_i32_0 = arith.constant 0 : i32
    return %arg0, %c0_i32, %arg2 : i32, i32, i32
  }
  func.func @transform_1(%arg0: i32, %arg1: i32, %arg2: i32, %arg3: memref<2xi32, #tpu.memory_space<smem>>) -> (i32, i32, i32) {
    %0 = arith.muli %arg2, %arg1 : i32
    %c0_i32 = arith.constant 0 : i32
    %c0_i32_0 = arith.constant 0 : i32
    return %arg0, %c0_i32, %0 : i32, i32, i32
  }
  func.func @transform_2(%arg0: i32, %arg1: i32, %arg2: i32, %arg3: memref<2xi32, #tpu.memory_space<smem>>) -> (i32, i32, i32) {
    %c0_i32 = arith.constant 0 : i32
    %c0_i32_0 = arith.constant 0 : i32
    %c0_i32_1 = arith.constant 0 : i32
    return %arg0, %c0_i32, %c0_i32_0 : i32, i32, i32
  }
}

</mosaic_0001>

<bundles_post_ra>
// kernel: gaussian_similarity_tmse.1
= control target key start
LH: loop header
LB: loop body
LE: loop exit
PB: predicated region body
PF: predicated region fallthrough
CT: control target
= control target key end

     0   :  { %s858_s0 = inlined_call_operand.vmem [shape: s32[2], index: 0, kind: input, shape index: {}]   ;;  %s859_s1 = inlined_call_operand.vmem [shape: bf16[2,4,128], index: 1, kind: input, shape index: {}]   ;;  %s860_s2 = inlined_call_operand.vmem [shape: bf16[2,32,128], index: 2, kind: input, shape index: {}]   ;;  %s861_s3 = inlined_call_operand.vmem [shape: f32[2,1,128], index: 3, kind: output, shape index: {}]  }
   0x1   :  { %s8_s14 = sshll.u32 %s858_s0, 4  ;;  %s9_s14 = int_to_ptr.vmem [resolvable:$true] %s8_s14 }
   0x2   :  { %s659_s15 = scalar_lea.vmem %s9_s14, 16  ;;  %p664_p1 = scmp.lt.s32.totalorder %s9_s14, %s9_s14 }
   0x3   :  { %p660_p0 = scmp.ne.s32.totalorder %s9_s14, %s659_s15  ;;  %p665_p2 = scmp.lt.s32.totalorder %s659_s15, %s659_s15 }
   0x5   :  { %p666_p3 = por %p665_p2, %p664_p1 }
   0x7   :  { %p667_p4 = pnand %p666_p3, %p660_p0 }
   0x9   :  { %670 = shalt.err (!%p667_p4)  }
   0xa   :  { %s713_s16 = smov [#allocation10]  }
   0xb   :  { %11 = dma.vmem_to_smem %s9_s14, 16, %s713_s16, [#allocation9] }
   0xc   :  { %691 = dma.done.wait [#allocation9], 16 }
   0xd   :  { %692 = vsyncadd [#allocation9], 4294967280 }
   0xe   :  { %13 = sfence }
   0xf   :  { %s742_s17 = smov 0   ;;  %s744_s18 = smov 0  }
  0x10   :  { %s746_s19 = smov 0   ;;  %s748_s0 = smov 0  }
  0x11   :  { %s750_s20 = smov 0  }
  0x12 LB: > { %s34_s21 = sadd.s32 1, %s703_s19  ;;  %s38_s22 = sadd.s32 1, %s707_s0  ;;  %s711_s20 = sphi %s750_s20, %s19_s20   ;;  %s707_s0 = sphi %s748_s0, %s865_s0   ;;  %s703_s19 = sphi %s746_s19, %s864_s19   ;;  %s699_s18 = sphi %s744_s18, %s863_s18   ;;  %s695_s17 = sphi %s742_s17, %s862_s17  }
  0x13   : > { %p36_p5 = scmp.ge.s32.totalorder %s34_s21, 2  ;;  %p554_p6 = scmp.ge.s32.totalorder %s711_s20, 1 }
  0x14   : > { %p161_p7 = scmp.lt.s32.totalorder %s711_s20, 5 }
  0x15   : > { %s867_s21 = smov (%p36_p5, %s34_s21), 0  ;;  %s869_s22 = smov (!%p36_p5, %s38_s22), %s707_s0 }
  0x16   : > { %p162_p8 = pnand %p554_p6, %p161_p7  ;;  %p40_p9 = scmp.ge.s32.totalorder %s869_s22, 2 }
  0x17   : > { %p192_p10 = scmp.lt.s32.totalorder (!%p162_p8), %s699_s18, 1  ;;  %s774_s23 = sld [smem:[#allocation10 + %s699_s18]] (!%p162_p8)  ;;  %v213_v0 = vlaneseq (!%p162_p8) }
  0x18   : > { %s871_s22 = smov (%p40_p9, %s869_s22), 0  ;;  %165 = sbr.rel (%p162_p8) target bundleno = 901 (0x385), region = 28 }
  0x19   : > { %p218_p11 = scmp.eq.s32.totalorder (!%p162_p8), %s695_s17, 0  ;;  %v779_v1 = vand.u32 (!%p162_p8), 127, %v213_v0 }
  0x1f   : > { %s873_s18 = smov (!%p192_p10, %s699_s18), 1  ;;  %223 = sbr.rel (!%p218_p11) target bundleno = 38 (0x26), region = 32 }
  0x20   : > { %s555_s24 = sshll.u32 %s873_s18, 1  ;;  %s566_s25 = sshll.u32 %s873_s18, 4  ;;  %vm224_vm0 = vcmask (%p218_p11), 3072   ;;  %vm229_vm1 = vcmask (%p218_p11), 7168   ;;  %v714_v2 = vmov (%p218_p11), -1e+30  }
  0x21   : > { %s786_s28 = scalar_lea.vmem %s859_s1, %s555_s24  ;;  %s791_s4 = scalar_lea.vmem %s860_s2, %s566_s25  ;;  %225 = vst.msk [vmem:[#allocation2] sm:$0xf] (%p218_p11), %vm224_vm0, %v714_v2  ;;  %v715_v3 = vmov (%p218_p11), 0.0  }
  0x22   : > { %s211_s7 = scalar_lea.vmem %s861_s3, %s873_s18  ;;  %226 = vst.msk [vmem:[#allocation3] sm:$0xf] (%p218_p11), %vm224_vm0, %v715_v3  ;;  %227 = vst.msk [vmem:[#allocation4] sm:$0xf] (%p218_p11), %vm224_vm0, %v715_v3 }
  0x23   : > { %228 = vst.msk [vmem:[#allocation5] sm:$0xf] (%p218_p11), %vm224_vm0, %v715_v3  ;;  %234 = vst [vmem:[#allocation7] sm:$0x1] (%p218_p11), %v715_v3 }
  0x24   : > { %230 = vst.msk [vmem:[#allocation6] sm:$0xff] (%p218_p11), %vm229_vm1, %v715_v3  ;;  %231 = vst.msk [vmem:[#allocation6 + $0x8] sm:$0xff] (%p218_p11), %vm229_vm1, %v715_v3 }
  0x25   : > { %232 = vst.msk [vmem:[#allocation6 + $0x10] sm:$0xff] (%p218_p11), %vm229_vm1, %v715_v3  ;;  %233 = vst.msk [vmem:[#allocation6 + $0x18] sm:$0xff] (%p218_p11), %vm229_vm1, %v715_v3 }
  0x26 PF: > { %p559_p12 = scmp.ne.s32.totalorder %s695_s17, 0 }
  0x27   : > { %v238_v4 = vld [vmem:[%s786_s28] sm:$0x3] (!%p559_p12)  ;;  %s560_s8 = sadd.s32 (!%p559_p12), 4294967295, %s774_s23  ;;  %vm247_vm2 = vcmask (!%p559_p12), 1043456   ;;  %v716_v9 = vmov (!%p559_p12), 0   ;;  %vm274_vm4 = vcmask (!%p559_p12), 3072  }
  0x28   : > { %237 = sbr.rel (%p559_p12) target bundleno = 483 (0x1e3), region = 36  ;;  %v239_v5 = vunpack.c.l.bf16 (!%p559_p12), %v238_v4  ;;  %v241_v6 = vstv (!%p559_p12), %s560_s8  ;;  %627 = vset.pattern.permute.xlu0 (!%p559_p12), %v716_v9  ;;  %v243_v10 = vld [vmem:[#allocation2] sm:$0xf] (!%p559_p12)  ;;  %s561_s9 = sadd.s32 (!%p559_p12), 4294967294, %s774_s23  ;;  %vm266_vm5 = vcmp.ge.s32.totalorder (!%p559_p12), %v779_v1, 1 }
  0x29   : > { %vm242_vm3 = vcmp.le.s32.totalorder (!%p559_p12), %v779_v1, %v241_v6  ;;  %v279_v17 = vstv (!%p559_p12), %s561_s9  ;;  %v264_v26 = vld [vmem:[#allocation3] sm:$0xf] (!%p559_p12)  ;;  %v276_v29 = vld [vmem:[#allocation4] sm:$0xf] (!%p559_p12) }
  0x2a   : > { %v246_v7 = vsel (!%p559_p12), %vm242_vm3, %v239_v5, -1e+30  ;;  %vm280_vm6 = vcmp.le.s32.totalorder (!%p559_p12), %v779_v1, %v279_v17 }
  0x2b   : > { %v248_v8 = vsel (!%p559_p12), %vm247_vm2, %v246_v7, -inf }
  0x2c   : > { %249 = vmax.xlane.f32.xlu0 (!%p559_p12), %v248_v8 }
  0xb9   : > { %v250_v11 = vpop.xlane.xlu0 %249 }
  0xba   : > { %v251_v12 = vmax.f32 %v243_v10, %v250_v11 }
  0xbc   : > { %v261_v13 = vsub.f32 %v243_v10, %v251_v12  ;;  %289 = vst.msk [vmem:[#allocation2] sm:$0xf] %vm274_vm4, %v251_v12  ;;  %254 = vperm.xlu0 %627, %v251_v12  }
  0xbe   : > { %v262_v24 = vmul.f32 1.442695, %v261_v13 }
 0x13b   : > { %v255_v14 = vpop.permute.xlu0 %254 }
 0x13c   : > { %v257_v15 = vsub.f32 %v239_v5, %v255_v14 }
 0x13e   : > { %v258_v16 = vmul.f32 1.442695, %v257_v15 }
 0x140   : > { %628 = vpow2.f32 %v258_v16 }
 0x141   : > { %630 = vpow2.f32 %v262_v24 }
 0x14a   : > { %v629_v18 = vpop.eup %628 }
 0x14b   : > { %v260_v19 = vsel %vm242_vm3, %v629_v18, 0.0  ;;  %v631_v25 = vpop.eup %630 }
 0x14c   : > { %v269_v20 = vsel %vm266_vm5, %v260_v19, 0.0  ;;  %v283_v22 = vsel %vm280_vm6, %v260_v19, 0.0  ;;  %v265_v27 = vmul.f32 %v631_v25, %v264_v26  ;;  %v277_v31 = vmul.f32 %v631_v25, %v276_v29 }
 0x14d   : > { %v270_v21 = vsel %vm247_vm2, %v269_v20, 0.0  ;;  %v284_v23 = vsel %vm247_vm2, %v283_v22, 0.0 }
 0x14e   : > { %271 = vadd.xlane.f32.xlu1 %v270_v21 }
 0x152   : > { %285 = vadd.xlane.f32.xlu1 %v284_v23 }
 0x1db   : > { %v272_v28 = vpop.xlane.xlu1 %271 }
 0x1dc   : > { %v273_v30 = vadd.f32 %v272_v28, %v265_v27 }
 0x1de   : > { %275 = vst.msk [vmem:[#allocation3] sm:$0xf] %vm274_vm4, %v273_v30 }
 0x1df   : > { %v286_v32 = vpop.xlane.xlu1 %285 }
 0x1e0   : > { %v287_v33 = vadd.f32 %v286_v32, %v277_v31 }
 0x1e2   : > { %288 = vst.msk [vmem:[#allocation4] sm:$0xf] %vm274_vm4, %v287_v33 }
 0x1e3 PF: > { %p562_p13 = scmp.ne.s32.totalorder %s695_s17, 1 }
 0x1e4   : > { %v325_v34 = vld [vmem:[#allocation6 + $0x10] sm:$0xff] (!%p562_p13)  ;;  %v323_v35 = vld [vmem:[#allocation6] sm:$0xff] (!%p562_p13)  ;;  %v717_v36 = vmov (!%p562_p13), 0   ;;  %v326_v42 = vld [vmem:[#allocation6 + $0x18] sm:$0xff] (!%p562_p13)  ;;  %s718_s10 = smov (!%p562_p13), 1   ;;  %vm311_vm7 = vcmp.eq.s32.totalorder (!%p562_p13), %v779_v1, 0 }
 0x1e5   : > { %293 = sbr.rel (%p562_p13) target bundleno = 901 (0x385), region = 40  ;;  %633 = vset.pattern.permute.xlu1 (!%p562_p13), %v717_v36  ;;  %632 = vset.pattern.permute.xlu0 (!%p562_p13), %v717_v36  ;;  %v569_v37 = vld [vmem:[%s791_s4] sm:$0xff] (!%p562_p13)   ;;  %v324_v43 = vld [vmem:[#allocation6 + $0x8] sm:$0xff] (!%p562_p13)  ;;  %v576_v44 = vld [vmem:[%s791_s4 + $0x8] sm:$0xff] (!%p562_p13)   ;;  %vm369_vm8 = vcmask (!%p562_p13), 1043456   ;;  %s830_s11 = sadd.s32 (!%p562_p13), 4294967295, %s774_s23 }
 0x1e6   : > { %347 = vperm.xlu1 (!%p562_p13), %633, %v325_v34   ;;  %337 = vperm.xlu0 (!%p562_p13), %632, %v323_v35   ;;  %v570_v38 = vunpack.c.l.bf16 (!%p562_p13), %v569_v37  ;;  %v571_v39 = vunpack.c.h.bf16 (!%p562_p13), %v569_v37  ;;  %v304_v40 = vld [vmem:[#allocation3] sm:$0xf] (!%p562_p13)  ;;  %v574_v45 = vunpack.c.l.bf16 (!%p562_p13), %v576_v44  ;;  %v575_v47 = vunpack.c.h.bf16 (!%p562_p13), %v576_v44  ;;  %v312_v48 = vld [vmem:[#allocation5] sm:$0xf] (!%p562_p13)  ;;  %v294_v49 = vld [vmem:[%s786_s28] sm:$0x3] (!%p562_p13) }
 0x1e7   : > { %649 = vlog2.f32 (!%p562_p13), %v304_v40  ;;  %v295_v53 = vunpack.c.l.bf16 (!%p562_p13), %v294_v49  ;;  %vm404_vm11 = vcmp.ge.s32.totalorder (!%p562_p13), %v779_v1, 1  ;;  %vm445_vm14 = vcmask (!%p562_p13), 1040384   ;;  %p456_p0 = scmp.gt.s32.totalorder (!%p562_p13), %s830_s11, 1  ;;  %p460_p1 = scmp.gt.s32.totalorder (!%p562_p13), %s774_s23, 1 }
 0x1e8   : > { %v634_v46 = vpack.i.bf16 (!%p562_p13), %v571_v39, %v570_v38  ;;  %v644_v57 = vpack.i.bf16 (!%p562_p13), %v574_v45, %v571_v39  ;;  %vm418_vm15 = vcmask (!%p562_p13), 3072   ;;  %vm436_vm0 = vcmask (!%p562_p13), 7168  }
 0x1e9   : > { %v307_v41 = vld [vmem:[#allocation4] sm:$0xf] (!%p562_p13)  ;;  %v639_v56 = vpack.i.bf16 (!%p562_p13), %v570_v38, %v295_v53 }
 0x1ea   : > { %651 = vlog2.f32 (!%p562_p13), %v307_v41  ;;  %352 = vperm.xlu1 (!%p562_p13), %633, %v326_v42   ;;  %342 = vperm.xlu0 (!%p562_p13), %632, %v324_v43  }
 0x1ee   : > { %331 = vrot.lane.b32.xlu1 %v574_v45, %s718_s10  ;;  %635 = vrot.lane.b32.xlu0 %v634_v46, %s718_s10  ;;  %v406_v46 = vstv %s830_s11  ;;  %s875_s11 = smov (!%p456_p0, %s830_s11), 1 }
 0x1ef   : > { %vm407_vm12 = vcmp.le.s32.totalorder %v779_v1, %v406_v46  ;;  %s458_s12 = scvt.s32.f32 %s875_s11 }
 0x1f0   : > { %vm408_vm13 = vmand %vm404_vm11, %vm407_vm12 }
 0x1f1   : > { %v650_v50 = vpop.eup %649  ;;  %s459_s13 = smul.f32 4.0, %s458_s12 }
 0x1f2   : > { %319 = vperm.xlu1 %633, %v312_v48   ;;  %333 = vrot.lane.b32.xlu0 %v575_v47, %s718_s10  ;;  %v306_v52 = vmul.f32 0.6931472, %v650_v50  ;;  %v409_v50 = vld [vmem:[#allocation7] sm:$0x1] }
 0x1f4   : > { %v652_v51 = vpop.eup %651 }
 0x1f5   : > { %v309_v54 = vmul.f32 0.6931472, %v652_v51 }
 0x1f6   : > { %313 = vrot.lane.b32.xlu1 %v295_v53, %s718_s10 }
 0x1f7   : > { %v310_v55 = vsub.f32 %v306_v52, %v309_v54 }
 0x1f9   : > { %362 = vperm.xlu0 %632, %v310_v55  }
 0x1fa   : > { %640 = vrot.lane.b32.xlu1 %v639_v56, %s718_s10 }
 0x1fe   : > { %645 = vrot.lane.b32.xlu1 %v644_v57, %s718_s10 }
 0x202   : > { %430 = vrot.lane.b32.xlu1 %v575_v47, %s718_s10 }
 0x265   : > { %v348_v58 = vpop.permute.xlu1 %347  ;;  %v338_v59 = vpop.permute.xlu0 %337 }
 0x269   : > { %v353_v60 = vpop.permute.xlu1 %352  ;;  %v343_v61 = vpop.permute.xlu0 %342 }
 0x26d   : > { %v332_v62 = vpop.permute.xlu1 %331  ;;  %v636_v63 = vpop.permute.xlu0 %635 }
 0x26e   : > { %v357_v0 = vsel %vm311_vm7, %v348_v58, %v332_v62  ;;  %v638_v2 = vunpack.i.h.bf16 %v636_v63  ;;  %v637_v3 = vunpack.i.l.bf16 %v636_v63  ;;  %v461_v62 = vstv %s459_s13 }
 0x26f   : > { %v379_v6 = vsub.f32 %v574_v45, %v357_v0 }
 0x270   : > { %v356_v4 = vsel %vm311_vm7, %v343_v61, %v638_v2  ;;  %v355_v5 = vsel %vm311_vm7, %v338_v59, %v637_v3 }
 0x271   : > { %v378_v7 = vsub.f32 %v571_v39, %v356_v4  ;;  %v377_v8 = vsub.f32 %v570_v38, %v355_v5  ;;  %v320_v9 = vpop.permute.xlu1 %319  ;;  %v334_v10 = vpop.permute.xlu0 %333  ;;  %v383_v15 = vmul.f32 %v379_v6, %v379_v6 }
 0x272   : > { %v358_v11 = vsel %vm311_vm7, %v353_v60, %v334_v10 }
 0x273   : > { %v382_v12 = vmul.f32 %v378_v7, %v378_v7  ;;  %v381_v13 = vmul.f32 %v377_v8, %v377_v8  ;;  %v380_v14 = vsub.f32 %v575_v47, %v358_v11 }
 0x275   : > { %v385_v16 = vadd.f32 %v382_v12, %v381_v13  ;;  %v314_v17 = vpop.permute.xlu1 %313  ;;  %v384_v19 = vmul.f32 %v380_v14, %v380_v14 }
 0x276   : > { %v322_v18 = vsel %vm311_vm7, %v320_v9, %v314_v17 }
 0x277   : > { %v386_v20 = vadd.f32 %v385_v16, %v383_v15  ;;  %v359_v21 = vsub.f32 %v295_v53, %v322_v18 }
 0x278   : > { %v363_v24 = vpop.permute.xlu0 %362 }
 0x279   : > { %v387_v22 = vadd.f32 %v386_v20, %v384_v19  ;;  %v365_v25 = vsub.f32 %v359_v21, %v363_v24  ;;  %v641_v56 = vpop.permute.xlu1 %640 }
 0x27a   : > { %v642_v57 = vunpack.i.l.bf16 %v641_v56  ;;  %v643_v58 = vunpack.i.h.bf16 %v641_v56 }
 0x27b   : > { %v388_v23 = vrot.slane %v387_v22, 4  ;;  %v366_v28 = vmul.f32 %v365_v25, %v365_v25 }
 0x27c   : > { %419 = vst.msk [vmem:[#allocation5] sm:$0xf] %vm418_vm15, %v642_v57 }
 0x27d   : > { %v389_v26 = vadd.f32 %v388_v23, %v387_v22  ;;  %v367_v31 = vmax.f32 %v366_v28, 0.0  ;;  %437 = vst.msk [vmem:[#allocation6] sm:$0xff] %vm436_vm0, %v643_v58  ;;  %v646_v1 = vpop.permute.xlu1 %645 }
 0x27e   : > { %v648_v59 = vunpack.i.h.bf16 %v646_v1  ;;  %v647_v60 = vunpack.i.l.bf16 %v646_v1 }
 0x27f   : > { %v390_v27 = vrot.slane %v389_v26, 2  ;;  %v368_v33 = vmin.f32 %v367_v31, 16.0 }
 0x280   : > { %438 = vst.msk [vmem:[#allocation6 + $0x8] sm:$0xff] %vm436_vm0, %v647_v60  ;;  %439 = vst.msk [vmem:[#allocation6 + $0x10] sm:$0xff] %vm436_vm0, %v648_v59 }
 0x281   : > { %v391_v29 = vadd.f32 %v390_v27, %v389_v26  ;;  %v370_v34 = vsel %vm369_vm8, %v368_v33, 0.0  ;;  %v431_v61 = vpop.permute.xlu1 %430 }
 0x282   : > { %v371_v35 = vrot.slane %v370_v34, 4  ;;  %440 = vst.msk [vmem:[#allocation6 + $0x18] sm:$0xff] %vm436_vm0, %v431_v61 }
 0x283   : > { %v392_v30 = vrot.slane %v391_v29, 1 }
 0x284   : > { %v372_v39 = vadd.f32 %v371_v35, %v370_v34 }
 0x285   : > { %v393_v32 = vadd.f32 %v392_v30, %v391_v29 }
 0x286   : > { %v373_v43 = vrot.slane %v372_v39, 2 }
 0x287   : > { %653 = vrsqrt.f32 %v393_v32  ;;  %vm396_vm9 = vcmp.eq.f32.partialorder %v393_v32, inf  ;;  %v399_v38 = vand.u32 2147483648, %v393_v32  ;;  %vm398_vm10 = vcmp.eq.f32.partialorder %v393_v32, 0.0 }
 0x288   : > { %v374_v45 = vadd.f32 %v373_v43, %v372_v39 }
 0x28a   : > { %v375_v47 = vrot.slane %v374_v45, 1 }
 0x28c   : > { %v376_v48 = vadd.f32 %v375_v47, %v374_v45 }
 0x291   : > { %v654_v36 = vpop.eup %653 }
 0x292   : > { %v395_v37 = vmul.f32 %v654_v36, %v393_v32 }
 0x294   : > { %v397_v40 = vsel %vm396_vm9, %v393_v32, %v395_v37 }
 0x295   : > { %v400_v41 = vsel %vm398_vm10, %v399_v38, %v397_v40 }
 0x296   : > { %v401_v42 = vmul.f32 -0.5, %v400_v41 }
 0x298   : > { %v402_v44 = vmul.f32 1.442695, %v401_v42 }
 0x29a   : > { %655 = vpow2.f32 %v402_v44 }
 0x29b   : > { %657 = vrcp.f32 %v461_v62 }
 0x2a4   : > { %v656_v49 = vpop.eup %655 }
 0x2a5   : > { %v410_v51 = vmul.f32 %v656_v49, %v376_v48  ;;  %v658_v6 = vpop.eup %657 }
 0x2a7   : > { %v411_v52 = vsel %vm408_vm13, %v410_v51, 0.0 }
 0x2a8   : > { %v412_v53 = vadd.f32 %v411_v52, %v409_v50 }
 0x2aa   : > { %413 = vst [vmem:[#allocation7] sm:$0x1] %v412_v53 }
 0x2b1   : > { %v444_v54 = vld [vmem:[#allocation7] sm:$0x1] }
 0x2b2   : > { %v446_v55 = vsel %vm445_vm14, %v444_v54, 0.0 }
 0x2b3   : > { %447 = vadd.xlane.f32.xlu0 %v446_v55 }
 0x340   : > { %v448_v63 = vpop.xlane.xlu0 %447 }
 0x341   : > { %v449_v0 = vrot.slane %v448_v63, 4 }
 0x343   : > { %v450_v2 = vadd.f32 %v449_v0, %v448_v63 }
 0x345   : > { %v451_v3 = vrot.slane %v450_v2, 2 }
 0x347   : > { %v452_v4 = vadd.f32 %v451_v3, %v450_v2 }
 0x349   : > { %v453_v5 = vrot.slane %v452_v4, 1 }
 0x34b   : > { %v454_v7 = vadd.f32 %v453_v5, %v452_v4 }
 0x34d   : > { %577 = vpush %v454_v7 }
 0x34e   : > { %579 = vpush %v658_v6 }
 0x37e   : > { %s578_s14 = spop %577 }
 0x37f   : > { %s580_s15 = spop %579 }
 0x380   : > { %s464_s16 = smul.f32 %s580_s15, %s578_s14 }
 0x382   : > { %s877_s16 = smov (!%p460_p1, %s464_s16), 0.0 }
 0x383   : > { %v466_v8 = vstv %s877_s16 }
 0x384   : > { %467 = vst [vmem:[%s211_s7] sm:$0x1] %v466_v8 }
 0x385 PF: > { %s19_s20 = sadd.s32 1, %s711_s20   ;;  %s862_s17 = smov %s703_s19 }
 0x386   : > { %p16_p2 = scmp.ge.s32.totalorder %s19_s20, 6   ;;  %s863_s18 = smov %s707_s0 }
 0x387   : > { %s864_s19 = smov %s867_s21  ;;  %s865_s0 = smov %s871_s22 }
 0x388   :  { %18 = sbr.rel (!%p16_p2) target bundleno = 18 (0x12), region = 77 }

</bundles_post_ra>
